<compile_context>
chip_gen: v7x
topology: tpu7x:2x2x1
jax: 0.10.0
libtpu: 0.0.40
codegen_flags: <defaults>
</compile_context>

<pallas_src>
import jax
import jax.numpy as jnp
from jax.experimental import pallas as pl
from jax.experimental.pallas import tpu as pltpu


def _linear_sub_relu_kernel(x1_ref, w_ref, x2_ref, o_ref):
    # v1 = x1 @ W  with W already in [K, N] layout -> canonical MXU matmul.
    v1 = jnp.dot(x1_ref[...], w_ref[...], preferred_element_type=jnp.float32)
    # v2 = v1 - x2 ; v3 = relu(v2)   (f32 elementwise, cast only at the store)
    v2 = v1 - x2_ref[...].astype(jnp.float32)
    o_ref[...] = jnp.maximum(v2, 0.0).astype(o_ref.dtype)


def linear_sub_relu(x1, w, x2, *, tm_cap=4096):
    """x1: [B, K], w: [N, K] (torch Linear convention), x2: [B, N] -> [B, N]."""
    B, K = x1.shape
    N, _ = w.shape

    # One-time tiny (32 KiB) transpose to [K, N]; the weight stays resident in
    # VMEM across all batch tiles (constant index_map below).
    w_kn = jnp.transpose(w)  # [K, N] = [128, 64]

    # Batch tile selection:
    #  - multiple of 8 (sublane alignment)
    #  - no larger than ceil(B/2) rounded up, so a large batch always yields
    #    >=2 grid steps and v7x's second TensorCore isn't idle
    #  - capped at tm_cap=4096: double-buffered x1/x2/out tiles ~8 MiB, inside
    #    v5e's 16 MiB default scoped VMEM (v6e/v7x have more headroom).
    half_b = (pl.cdiv(B, 2) + 7) // 8 * 8
    tm = max(8, min(tm_cap, half_b))
    grid = pl.cdiv(B, tm)  # ragged last block handled by Pallas (masked writeback)

    itemsize = jnp.dtype(x1.dtype).itemsize
    out = pl.pallas_call(
        _linear_sub_relu_kernel,
        out_shape=jax.ShapeDtypeStruct((B, N), x1.dtype),
        grid=(grid,),
        in_specs=[
            pl.BlockSpec((tm, K), lambda i: (i, 0)),  # x1: streamed per batch tile
            pl.BlockSpec((K, N), lambda i: (0, 0)),   # W : resident [128, 64]
            pl.BlockSpec((tm, N), lambda i: (i, 0)),  # x2: streamed per batch tile
        ],
        out_specs=pl.BlockSpec((tm, N), lambda i: (i, 0)),
        compiler_params=pltpu.CompilerParams(
            dimension_semantics=("parallel",),        # shard batch tiles across TCs
        ),
        cost_estimate=pl.CostEstimate(
            flops=2 * B * K * N,
            bytes_accessed=B * (K + 2 * N) * itemsize + N * K * itemsize,
            transcendentals=0,
        ),
    )(x1, w_kn, x2)
    return out


if __name__ == "__main__":
    # NOTE: at B=1 this is launch-overhead dominated (a fused XLA matvec would
    # win); the kernel is written for the realistic large-B, HBM-bound regime.
    key = jax.random.PRNGKey(0)
    k1, k2, k3 = jax.random.split(key, 3)

    B, IN, OUT = 1, 128, 64
    x1 = jax.random.normal(k1, (B, IN), dtype=jnp.float32)
    x2 = jax.random.normal(k2, (B, OUT), dtype=jnp.float32)
    # Deterministic init of Linear(128, 64, bias=False) weight: [64, 128]
    bound = 1.0 / (IN ** 0.5)
    w = jax.random.uniform(k3, (OUT, IN), dtype=jnp.float32,
                           minval=-bound, maxval=bound)

    out = linear_sub_relu(x1, w, x2)
    out = jax.block_until_ready(out)

    # reference check in plain JAX
    ref = jnp.maximum(x1 @ w.T - x2, 0.0)
    assert out.shape == (B, OUT)
    assert jnp.allclose(out, ref, atol=1e-5, rtol=1e-5)

    # also exercise a ragged, multi-tile batch to validate the no-pad path
    B2 = 2051
    x1b = jax.random.normal(k1, (B2, IN), dtype=jnp.float32)
    x2b = jax.random.normal(k2, (B2, OUT), dtype=jnp.float32)
    outb = jax.block_until_ready(linear_sub_relu(x1b, w, x2b))
    refb = jnp.maximum(x1b @ w.T - x2b, 0.0)
    assert outb.shape == (B2, OUT)
    assert jnp.allclose(outb, refb, atol=1e-4, rtol=1e-5)

    print("KERNEL_OK")
</pallas_src>

<mosaic_0001>
module attributes {stable_mosaic.version = 11 : i64} {
  func.func @_linear_sub_relu_kernel(%arg0: i32, %arg1: memref<8x128xf32, #tpu.memory_space<vmem>>, %arg2: memref<128x64xf32, #tpu.memory_space<vmem>>, %arg3: memref<8x64xf32, #tpu.memory_space<vmem>>, %arg4: memref<8x64xf32, #tpu.memory_space<vmem>>) attributes {dimension_semantics = [#tpu.dimension_semantics<parallel>], iteration_bounds = array<i64: 1>, scalar_prefetch = 0 : i64, scratch_operands = 0 : i64, tpu.core_type = #tpu.core_type<tc>, window_params = [{transform_indices = @transform_0, window_bounds = array<i64: 8, 128>}, {pipeline_mode = #tpu.pipeline_mode<synchronous>, transform_indices = @transform_1, window_bounds = array<i64: 128, 64>}, {transform_indices = @transform_2, window_bounds = array<i64: 8, 64>}, {transform_indices = @transform_3, window_bounds = array<i64: 8, 64>}]} {
    %c0 = arith.constant 0 : index
    %c0_0 = arith.constant 0 : index
    %0 = vector.load %arg1[%c0, %c0_0] : memref<8x128xf32, #tpu.memory_space<vmem>>, vector<8x128xf32>
    %c0_1 = arith.constant 0 : index
    %c0_2 = arith.constant 0 : index
    %1 = vector.load %arg2[%c0_1, %c0_2] : memref<128x64xf32, #tpu.memory_space<vmem>>, vector<128x64xf32>
    %cst = arith.constant dense<0.000000e+00> : vector<8x64xf32>
    %2 = tpu.matmul %0, %1, %cst {dimension_numbers = #tpu.dot_dimension_numbers<[1], [0], [0], [1], [0, 0, 1, 1], [], []>} : vector<8x128xf32>, vector<128x64xf32>, vector<8x64xf32> -> vector<8x64xf32>
    %c0_3 = arith.constant 0 : index
    %c0_4 = arith.constant 0 : index
    %3 = vector.load %arg3[%c0_3, %c0_4] : memref<8x64xf32, #tpu.memory_space<vmem>>, vector<8x64xf32>
    %4 = arith.subf %2, %3 : vector<8x64xf32>
    %cst_5 = arith.constant 0.000000e+00 : f32
    %5 = vector.broadcast %cst_5 : f32 to vector<8x64xf32>
    %6 = arith.maximumf %4, %5 : vector<8x64xf32>
    %c0_6 = arith.constant 0 : index
    %c0_7 = arith.constant 0 : index
    %7 = vector.load %arg4[%c0_6, %c0_7] : memref<8x64xf32, #tpu.memory_space<vmem>>, vector<8x64xf32>
    tpu.vector_store %arg4[%c0_6, %c0_7], %6 {strides = array<i32>} : memref<8x64xf32, #tpu.memory_space<vmem>>, vector<8x64xf32>,
    return
  }
  func.func @transform_0(%arg0: i32) -> (i32, i32) {
    %c0_i32 = arith.constant 0 : i32
    %c0_i32_0 = arith.constant 0 : i32
    return %arg0, %c0_i32 : i32, i32
  }
  func.func @transform_1(%arg0: i32) -> (i32, i32) {
    %c0_i32 = arith.constant 0 : i32
    %c0_i32_0 = arith.constant 0 : i32
    %c0_i32_1 = arith.constant 0 : i32
    return %c0_i32, %c0_i32_0 : i32, i32
  }
  func.func @transform_2(%arg0: i32) -> (i32, i32) {
    %c0_i32 = arith.constant 0 : i32
    %c0_i32_0 = arith.constant 0 : i32
    return %arg0, %c0_i32 : i32, i32
  }
  func.func @transform_3(%arg0: i32) -> (i32, i32) {
    %c0_i32 = arith.constant 0 : i32
    %c0_i32_0 = arith.constant 0 : i32
    return %arg0, %c0_i32 : i32, i32
  }
}

</mosaic_0001>

<bundles_post_ra>
// kernel: tpu_custom_call.1
= control target key start
LH: loop header
LB: loop body
LE: loop exit
PB: predicated region body
PF: predicated region fallthrough
CT: control target
= control target key end

     0   :  { %8 = vsyncpa [#allocation3], 0  ;;  %v229_v2 = vmov 0.0|0.0   ;;  %vm230_vm0 = vmmov 0   ;;  %v231_v6 = vmov 0.0   ;;  %vm105_vm1 = vcmask 523264   ;;  %s321_s0 = inlined_call_operand.vmem [shape: f32[1,128], index: 0, kind: input, shape index: {}]   ;;  %s322_s1 = inlined_call_operand.vmem [shape: f32[128,64], index: 1, kind: input, shape index: {}]   ;;  %s323_s2 = inlined_call_operand.vmem [shape: f32[1,64], index: 2, kind: input, shape index: {}]   ;;  %s324_s3 = inlined_call_operand.hbm [shape: f32[1,64], index: 3, kind: output, shape index: {}]  }
   0x1   :  { %v16_v0 = vld [vmem:[%s322_s1] sm:$0xff]  ;;  %v17_v1 = vld [vmem:[%s322_s1 + $0x8] sm:$0xff]  ;;  %175 = vmatprep.subr.bf16.mxu0 %v229_v2  ;;  %v18_v4 = vld [vmem:[%s322_s1 + $0x10] sm:$0xff]  ;;  %172 = vmatprep.mubr.msk.f32.mxu0 %vm230_vm0, %v231_v6 }
   0x2   :  { %v176_v3 = vpack.c.bf16 %v17_v1, %v16_v0  ;;  %v19_v5 = vld [vmem:[%s322_s1 + $0x18] sm:$0xff]  ;;  %v20_v8 = vld [vmem:[%s322_s1 + $0x20] sm:$0xff]  ;;  %v21_v9 = vld [vmem:[%s322_s1 + $0x28] sm:$0xff] }
   0x3   :  { %v179_v7 = vpack.c.bf16 %v19_v5, %v18_v4  ;;  %v182_v10 = vpack.c.bf16 %v21_v9, %v20_v8  ;;  %v22_v11 = vld [vmem:[%s322_s1 + $0x30] sm:$0xff]  ;;  %v23_v12 = vld [vmem:[%s322_s1 + $0x38] sm:$0xff]  ;;  %v24_v14 = vld [vmem:[%s322_s1 + $0x40] sm:$0xff] }
   0x4   :  { %177 = vmatpush3.bf16.msra.mxu0 %v176_v3  ;;  %v185_v13 = vpack.c.bf16 %v23_v12, %v22_v11  ;;  %v25_v15 = vld [vmem:[%s322_s1 + $0x48] sm:$0xff]  ;;  %v26_v17 = vld [vmem:[%s322_s1 + $0x50] sm:$0xff]  ;;  %v27_v18 = vld [vmem:[%s322_s1 + $0x58] sm:$0xff] }
   0x5   :  { %178 = vmatprep.subr.bf16.mxu0 %v229_v2  ;;  %v188_v16 = vpack.c.bf16 %v25_v15, %v24_v14  ;;  %v191_v19 = vpack.c.bf16 %v27_v18, %v26_v17  ;;  %v28_v20 = vld [vmem:[%s322_s1 + $0x60] sm:$0xff]  ;;  %v29_v21 = vld [vmem:[%s322_s1 + $0x68] sm:$0xff]  ;;  %v30_v23 = vld [vmem:[%s322_s1 + $0x70] sm:$0xff] }
   0x6   :  { %v194_v22 = vpack.c.bf16 %v29_v21, %v28_v20  ;;  %v31_v24 = vld [vmem:[%s322_s1 + $0x78] sm:$0xff]  ;;  %v15_v26 = vld [vmem:[%s321_s0] sm:$0xff] }
   0x7   :  { %v197_v25 = vpack.c.bf16 %v31_v24, %v30_v23  ;;  %v102_v27 = vld [vmem:[%s323_s2] sm:$0xff] }
   0x8   :  { %180 = vmatpush3.bf16.msra.mxu0 %v179_v7 }
   0x9   :  { %181 = vmatprep.subr.bf16.mxu0 %v229_v2 }
   0xc   :  { %183 = vmatpush3.bf16.msra.mxu0 %v182_v10 }
   0xd   :  { %184 = vmatprep.subr.bf16.mxu0 %v229_v2 }
  0x10   :  { %186 = vmatpush3.bf16.msra.mxu0 %v185_v13 }
  0x11   :  { %187 = vmatprep.subr.bf16.mxu0 %v229_v2 }
  0x14   :  { %189 = vmatpush3.bf16.msra.mxu0 %v188_v16 }
  0x15   :  { %190 = vmatprep.subr.bf16.mxu0 %v229_v2 }
  0x18   :  { %192 = vmatpush3.bf16.msra.mxu0 %v191_v19 }
  0x19   :  { %193 = vmatprep.subr.bf16.mxu0 %v229_v2 }
  0x1c   :  { %195 = vmatpush3.bf16.msra.mxu0 %v194_v22 }
  0x1d   :  { %196 = vmatprep.subr.bf16.mxu0 %v229_v2 }
  0x20   :  { %198 = vmatpush3.bf16.msra.mxu0 %v197_v25 }
  0x23   :  { %173 = vmatmul.mubr.f32.vlgmr.msra.gmra.mrb[0].mxu0 %v15_v26 }
  0xf6   :  { %v98_v28 = vpop.f32.mrb[0].mxu0 }
  0xf7   :  { %v103_v29 = vsub.f32 %v98_v28, %v102_v27  ;;  %v174_v30 = vpop.f32.mrb[1].mxu0 }
  0xf9   :  { %v104_v31 = vmax.f32 %v103_v29, 0.0 }
  0xfb   :  { %106 = vst.msk [vmem:[#allocation2] sm:$0xff] %vm105_vm1, %v104_v31 }
  0xfc   :  { %111 = vsyncadd [#allocation3], 112  ;;  %s232_s1 = smov [#allocation2]  }
  0xfd   :  { %s112_s21 = sshll.u32 %s232_s1, 4  ;;  %s113_s21 = int_to_ptr.vmem [resolvable:$true] %s112_s21 }
  0xfe   :  { %s205_s22 = scalar_lea.vmem %s113_s21, 16  ;;  %s209_s23 = scalar_lea.vmem %s113_s21, 128 }
  0xff   :  { %p206_p0 = scmp.ne.s32.totalorder %s113_s21, %s205_s22  ;;  %p210_p1 = scmp.lt.s32.totalorder %s113_s21, %s113_s21 }
 0x100   :  { %p211_p2 = scmp.lt.s32.totalorder %s209_s23, %s205_s22 }
 0x102   :  { %p212_p3 = por %p211_p2, %p210_p1 }
 0x104   :  { %p213_p4 = pnand %p212_p3, %p206_p0 }
 0x106   :  { %216 = shalt.err (!%p213_p4)
}
 0x107   :  { %s217_s24 = scalar_lea.hbm %s324_s3, 16 }
 0x108   :  { %p218_p5 = scmp.ne.s32.totalorder %s324_s3, %s217_s24  ;;  %p221_p6 = scmp.lt.u32.totalorder %s217_s24, %s324_s3 }
 0x10a   :  { %p223_p7 = pnand %p221_p6, %p218_p5 }
 0x10c   :  { %226 = shalt.err (!%p223_p7)
}
 0x10d   :  { %s233_s29 = smov 16   ;;  %s234_s30 = smov 1  }
 0x10e   :  { %118 = dma.vmem_to_hbm [thread:$0]  %s113_s21, 16, %s324_s3, [#allocation3], %s233_s29, %s233_s29, %s234_s30  }
 0x10f   :  { %227 = dma.done.wait [#allocation3], 128  }
 0x110   :  { %228 = vsyncadd [#allocation3], 4294967168 }
 0x111   :  { %122 = vsyncpa [#allocation3], 1 }

</bundles_post_ra>
